<compile_context>
chip_gen: v7x
topology: tpu7x:2x2x1
jax: 0.10.0
libtpu: 0.0.40
codegen_flags: <defaults>
</compile_context>

<pallas_src>
import jax
import jax.numpy as jnp
from jax.experimental import pallas as pl
from jax.experimental.pallas import tpu as pltpu


def _round_up(n, m):
    return ((n + m - 1) // m) * m


def multitask_kernel(x_ref, w1_ref, b1_ref, w2_ref, b2_ref, wh_ref, bh_ref,
                     out_ref):
    # x tile: (TB, 20) bf16; all matmuls accumulate in f32 on the MXU.
    x = x_ref[...]

    # fc1 + relu (bias/ReLU in f32)
    h1 = jnp.dot(x, w1_ref[...], preferred_element_type=jnp.float32) + b1_ref[...]
    h1 = jnp.maximum(h1, 0.0)                                   # (TB, 64) f32

    # fc2 + relu
    h2 = jnp.dot(h1.astype(jnp.bfloat16), w2_ref[...],
                 preferred_element_type=jnp.float32) + b2_ref[...]
    h2 = jnp.maximum(h2, 0.0)                                   # (TB, 32) f32

    # dropout: identity in eval mode

    # fused classification+regression head: (TB, 3) = [class(2) | reg(1)]
    out_ref[...] = (jnp.dot(h2.astype(jnp.bfloat16), wh_ref[...],
                            preferred_element_type=jnp.float32) + bh_ref[...])


def multitask_forward(x, params, tile_b=256):
    """Run the MultitaskNN forward pass with a batch-tiled Pallas call.

    x: (B, 20) float32.  Returns (class_out (B, 2), reg_out (B, 1)) in f32.
    """
    B = x.shape[0]
    w1, b1, w2, b2, wc, bc, wr, br = params

    # Fuse the two heads: wh (32, 3), bh (1, 3).
    wh = jnp.concatenate([wc, wr], axis=1)
    bh = jnp.concatenate([bc, br], axis=1)

    # Batch tile: multiple of 8 (sublane), <= tile_b; pad the batch tail.
    TB = max(8, min(tile_b, _round_up(B, 8)))
    B_pad = _round_up(B, TB)
    if B_pad != B:
        x = jnp.pad(x, ((0, B_pad - B), (0, 0)))

    # bf16 operands for the MXU; biases stay f32.
    xb = x.astype(jnp.bfloat16)
    w1b = w1.astype(jnp.bfloat16)
    w2b = w2.astype(jnp.bfloat16)
    whb = wh.astype(jnp.bfloat16)

    grid = (B_pad // TB,)

    def const_spec(a):
        # Full-array block, same block every grid step -> stays resident.
        return pl.BlockSpec(a.shape, lambda i: (0, 0))

    flops = 2 * B_pad * (20 * 64 + 64 * 32 + 32 * 3)
    bytes_accessed = (
        B_pad * (20 * 2 + 3 * 4)                       # x (bf16) + fused out (f32)
        + (w1b.size + w2b.size + whb.size) * 2         # bf16 weights
        + (b1.size + b2.size + bh.size) * 4            # f32 biases
    )

    fused = pl.pallas_call(
        multitask_kernel,
        out_shape=jax.ShapeDtypeStruct((B_pad, 3), jnp.float32),
        grid=grid,
        in_specs=[
            pl.BlockSpec((TB, 20), lambda i: (i, 0)),
            const_spec(w1b), const_spec(b1),
            const_spec(w2b), const_spec(b2),
            const_spec(whb), const_spec(bh),
        ],
        out_specs=pl.BlockSpec((TB, 3), lambda i: (i, 0)),
        compiler_params=pltpu.CompilerParams(
            dimension_semantics=("parallel",)),
        cost_estimate=pl.CostEstimate(
            flops=flops, transcendentals=0, bytes_accessed=bytes_accessed),
    )(xb, w1b, b1, w2b, b2, whb, bh)

    fused = fused[:B]
    return fused[:, :2], fused[:, 2:3]


def init_params(key):
    """Deterministic synthetic parameters matching MultitaskNN.__init__ shapes.

    Weights are stored transposed relative to PyTorch: (in_features, out_features).
    """
    ks = jax.random.split(key, 8)

    def linear(kw, kb, fan_in, fan_out):
        bound = 1.0 / jnp.sqrt(fan_in)
        w = jax.random.uniform(kw, (fan_in, fan_out), jnp.float32, -bound, bound)
        b = jax.random.uniform(kb, (1, fan_out), jnp.float32, -bound, bound)
        return w, b

    w1, b1 = linear(ks[0], ks[1], 20, 64)   # fc1
    w2, b2 = linear(ks[2], ks[3], 64, 32)   # fc2
    wc, bc = linear(ks[4], ks[5], 32, 2)    # fc_class
    wr, br = linear(ks[6], ks[7], 32, 1)    # fc_reg
    return (w1, b1, w2, b2, wc, bc, wr, br)


def reference_forward(x, params):
    """Plain-JAX reference with the same bf16-operand / f32-accumulate recipe."""
    w1, b1, w2, b2, wc, bc, wr, br = params

    def bf(a):
        return a.astype(jnp.bfloat16).astype(jnp.float32)

    h1 = jnp.maximum(jnp.dot(bf(x), bf(w1)) + b1, 0.0)
    h2 = jnp.maximum(jnp.dot(bf(h1), bf(w2)) + b2, 0.0)
    cls = jnp.dot(bf(h2), bf(wc)) + bc
    reg = jnp.dot(bf(h2), bf(wr)) + br
    return cls, reg


if __name__ == "__main__":
    key = jax.random.PRNGKey(0)
    k_params, k_x = jax.random.split(key)

    params = init_params(k_params)
    x = jax.random.normal(k_x, (8, 20), jnp.float32)   # batch=8, in_features=20

    class_out, reg_out = multitask_forward(x, params)
    class_out = jax.block_until_ready(class_out)
    reg_out = jax.block_until_ready(reg_out)

    ref_cls, ref_reg = reference_forward(x, params)
    assert class_out.shape == (8, 2) and reg_out.shape == (8, 1)
    # bf16 MXU operands -> looser tolerance than pure f32.
    assert jnp.allclose(class_out, ref_cls, atol=2e-2, rtol=2e-2)
    assert jnp.allclose(reg_out, ref_reg, atol=2e-2, rtol=2e-2)

    print("KERNEL_OK")
</pallas_src>

<mosaic_0001>
module attributes {stable_mosaic.version = 11 : i64} {
  func.func @multitask_kernel(%arg0: i32, %arg1: memref<8x20xbf16, #tpu.memory_space<vmem>>, %arg2: memref<20x64xbf16, #tpu.memory_space<vmem>>, %arg3: memref<1x64xf32, #tpu.memory_space<vmem>>, %arg4: memref<64x32xbf16, #tpu.memory_space<vmem>>, %arg5: memref<1x32xf32, #tpu.memory_space<vmem>>, %arg6: memref<32x3xbf16, #tpu.memory_space<vmem>>, %arg7: memref<1x3xf32, #tpu.memory_space<vmem>>, %arg8: memref<8x3xf32, #tpu.memory_space<vmem>>) attributes {dimension_semantics = [#tpu.dimension_semantics<parallel>], iteration_bounds = array<i64: 1>, scalar_prefetch = 0 : i64, scratch_operands = 0 : i64, tpu.core_type = #tpu.core_type<tc>, window_params = [{transform_indices = @transform_0, window_bounds = array<i64: 8, 20>}, {pipeline_mode = #tpu.pipeline_mode<synchronous>, transform_indices = @transform_1, window_bounds = array<i64: 20, 64>}, {pipeline_mode = #tpu.pipeline_mode<synchronous>, transform_indices = @transform_2, window_bounds = array<i64: 1, 64>}, {pipeline_mode = #tpu.pipeline_mode<synchronous>, transform_indices = @transform_3, window_bounds = array<i64: 64, 32>}, {pipeline_mode = #tpu.pipeline_mode<synchronous>, transform_indices = @transform_4, window_bounds = array<i64: 1, 32>}, {pipeline_mode = #tpu.pipeline_mode<synchronous>, transform_indices = @transform_5, window_bounds = array<i64: 32, 3>}, {pipeline_mode = #tpu.pipeline_mode<synchronous>, transform_indices = @transform_6, window_bounds = array<i64: 1, 3>}, {transform_indices = @transform_7, window_bounds = array<i64: 8, 3>}]} {
    %c0 = arith.constant 0 : index
    %c0_0 = arith.constant 0 : index
    %0 = vector.load %arg1[%c0, %c0_0] : memref<8x20xbf16, #tpu.memory_space<vmem>>, vector<8x20xbf16>
    %c0_1 = arith.constant 0 : index
    %c0_2 = arith.constant 0 : index
    %1 = vector.load %arg2[%c0_1, %c0_2] : memref<20x64xbf16, #tpu.memory_space<vmem>>, vector<20x64xbf16>
    %cst = arith.constant dense<0.000000e+00> : vector<8x64xf32>
    %2 = tpu.matmul %0, %1, %cst {dimension_numbers = #tpu.dot_dimension_numbers<[1], [0], [0], [1], [0, 0, 1, 1], [], []>} : vector<8x20xbf16>, vector<20x64xbf16>, vector<8x64xf32> -> vector<8x64xf32>
    %c0_3 = arith.constant 0 : index
    %c0_4 = arith.constant 0 : index
    %3 = vector.load %arg3[%c0_3, %c0_4] : memref<1x64xf32, #tpu.memory_space<vmem>>, vector<1x64xf32>
    %4 = vector.broadcast %3 : vector<1x64xf32> to vector<8x64xf32>
    %5 = arith.addf %2, %4 : vector<8x64xf32>
    %cst_5 = arith.constant 0.000000e+00 : f32
    %6 = vector.broadcast %cst_5 : f32 to vector<8x64xf32>
    %7 = arith.maximumf %5, %6 : vector<8x64xf32>
    %8 = arith.truncf %7 : vector<8x64xf32> to vector<8x64xbf16>
    %c0_6 = arith.constant 0 : index
    %c0_7 = arith.constant 0 : index
    %9 = vector.load %arg4[%c0_6, %c0_7] : memref<64x32xbf16, #tpu.memory_space<vmem>>, vector<64x32xbf16>
    %cst_8 = arith.constant dense<0.000000e+00> : vector<8x32xf32>
    %10 = tpu.matmul %8, %9, %cst_8 {dimension_numbers = #tpu.dot_dimension_numbers<[1], [0], [0], [1], [0, 0, 1, 1], [], []>} : vector<8x64xbf16>, vector<64x32xbf16>, vector<8x32xf32> -> vector<8x32xf32>
    %c0_9 = arith.constant 0 : index
    %c0_10 = arith.constant 0 : index
    %11 = vector.load %arg5[%c0_9, %c0_10] : memref<1x32xf32, #tpu.memory_space<vmem>>, vector<1x32xf32>
    %12 = vector.broadcast %11 : vector<1x32xf32> to vector<8x32xf32>
    %13 = arith.addf %10, %12 : vector<8x32xf32>
    %cst_11 = arith.constant 0.000000e+00 : f32
    %14 = vector.broadcast %cst_11 : f32 to vector<8x32xf32>
    %15 = arith.maximumf %13, %14 : vector<8x32xf32>
    %16 = arith.truncf %15 : vector<8x32xf32> to vector<8x32xbf16>
    %c0_12 = arith.constant 0 : index
    %c0_13 = arith.constant 0 : index
    %17 = vector.load %arg6[%c0_12, %c0_13] : memref<32x3xbf16, #tpu.memory_space<vmem>>, vector<32x3xbf16>
    %cst_14 = arith.constant dense<0.000000e+00> : vector<8x3xf32>
    %18 = tpu.matmul %16, %17, %cst_14 {dimension_numbers = #tpu.dot_dimension_numbers<[1], [0], [0], [1], [0, 0, 1, 1], [], []>} : vector<8x32xbf16>, vector<32x3xbf16>, vector<8x3xf32> -> vector<8x3xf32>
    %c0_15 = arith.constant 0 : index
    %c0_16 = arith.constant 0 : index
    %19 = vector.load %arg7[%c0_15, %c0_16] : memref<1x3xf32, #tpu.memory_space<vmem>>, vector<1x3xf32>
    %20 = vector.broadcast %19 : vector<1x3xf32> to vector<8x3xf32>
    %21 = arith.addf %18, %20 : vector<8x3xf32>
    %c0_17 = arith.constant 0 : index
    %c0_18 = arith.constant 0 : index
    %22 = vector.load %arg8[%c0_17, %c0_18] : memref<8x3xf32, #tpu.memory_space<vmem>>, vector<8x3xf32>
    tpu.vector_store %arg8[%c0_17, %c0_18], %21 {strides = array<i32>} : memref<8x3xf32, #tpu.memory_space<vmem>>, vector<8x3xf32>,
    return
  }
  func.func @transform_0(%arg0: i32) -> (i32, i32) {
    %c0_i32 = arith.constant 0 : i32
    %c0_i32_0 = arith.constant 0 : i32
    return %arg0, %c0_i32 : i32, i32
  }
  func.func @transform_1(%arg0: i32) -> (i32, i32) {
    %c0_i32 = arith.constant 0 : i32
    %c0_i32_0 = arith.constant 0 : i32
    %c0_i32_1 = arith.constant 0 : i32
    return %c0_i32, %c0_i32_0 : i32, i32
  }
  func.func @transform_2(%arg0: i32) -> (i32, i32) {
    %c0_i32 = arith.constant 0 : i32
    %c0_i32_0 = arith.constant 0 : i32
    %c0_i32_1 = arith.constant 0 : i32
    return %c0_i32, %c0_i32_0 : i32, i32
  }
  func.func @transform_3(%arg0: i32) -> (i32, i32) {
    %c0_i32 = arith.constant 0 : i32
    %c0_i32_0 = arith.constant 0 : i32
    %c0_i32_1 = arith.constant 0 : i32
    return %c0_i32, %c0_i32_0 : i32, i32
  }
  func.func @transform_4(%arg0: i32) -> (i32, i32) {
    %c0_i32 = arith.constant 0 : i32
    %c0_i32_0 = arith.constant 0 : i32
    %c0_i32_1 = arith.constant 0 : i32
    return %c0_i32, %c0_i32_0 : i32, i32
  }
  func.func @transform_5(%arg0: i32) -> (i32, i32) {
    %c0_i32 = arith.constant 0 : i32
    %c0_i32_0 = arith.constant 0 : i32
    %c0_i32_1 = arith.constant 0 : i32
    return %c0_i32, %c0_i32_0 : i32, i32
  }
  func.func @transform_6(%arg0: i32) -> (i32, i32) {
    %c0_i32 = arith.constant 0 : i32
    %c0_i32_0 = arith.constant 0 : i32
    %c0_i32_1 = arith.constant 0 : i32
    return %c0_i32, %c0_i32_0 : i32, i32
  }
  func.func @transform_7(%arg0: i32) -> (i32, i32) {
    %c0_i32 = arith.constant 0 : i32
    %c0_i32_0 = arith.constant 0 : i32
    return %arg0, %c0_i32 : i32, i32
  }
}

</mosaic_0001>

<bundles_post_ra>
// kernel: tpu_custom_call.1
= control target key start
LH: loop header
LB: loop body
LE: loop exit
PB: predicated region body
PF: predicated region fallthrough
CT: control target
= control target key end

     0   :  { %v318_v0 = vmov 0.0   ;;  %vm51_vm0 = vcmask 1041408   ;;  %vm319_vm1 = vmmov 0   ;;  %vm47_vm2 = vcmask 162816   ;;  %s402_s1 = inlined_call_operand.vmem [shape: bf16[20,64], index: 1, kind: input, shape index: {}]   ;;  %s403_s3 = inlined_call_operand.vmem [shape: bf16[64,32], index: 3, kind: input, shape index: {}]   ;;  %s404_s0 = inlined_call_operand.vmem [shape: bf16[8,20], index: 0, kind: input, shape index: {}]   ;;  %s405_s5 = inlined_call_operand.vmem [shape: bf16[32,3], index: 5, kind: input, shape index: {}]   ;;  %s406_s2 = inlined_call_operand.vmem [shape: f32[1,64], index: 2, kind: input, shape index: {}]   ;;  %s407_s4 = inlined_call_operand.vmem [shape: f32[1,32], index: 4, kind: input, shape index: {}]   ;;  %s408_s6 = inlined_call_operand.vmem [shape: f32[1,3], index: 6, kind: input, shape index: {}]   ;;  %s409_s7 = inlined_call_operand.vmem [shape: f32[8,3], index: 7, kind: output, shape index: {}]  }
   0x1   :  { %280 = vmatprep.subr.bf16.mxu0 %v318_v0  ;;  %v310_v1 = vld [vmem:[%s402_s1] sm:$0xff]   ;;  %284 = vmatprep.mubr.msk.bf16.mxu0 %vm319_vm1, %v318_v0  ;;  %v311_v2 = vld [vmem:[%s402_s1 + $0x8] ss:$0 sps:$4 sm:$0x33]   ;;  %v314_v7 = vld [vmem:[%s403_s3 + $0x10] sm:$0xff]   ;;  %vm136_vm3 = vcmask 523264  }
   0x2   :  { %288 = vmatprep.subr.bf16.mxu1 %v318_v0  ;;  %v312_v3 = vld [vmem:[%s403_s3] sm:$0xff]   ;;  %296 = vmatprep.mubr.msk.bf16.mxu1 %vm319_vm1, %v318_v0  ;;  %v53_v4 = vsel %vm51_vm0, %v311_v2, 0  ;;  %v313_v5 = vld [vmem:[%s403_s3 + $0x8] sm:$0xff]   ;;  %v315_v8 = vld [vmem:[%s403_s3 + $0x18] sm:$0xff]   ;;  %vm205_vm4 = vcmask 261120   ;;  %vm249_vm5 = vcmask 23552  }
   0x3   :  { %281 = vmatpush3.bf16.msra.mxu0 %v310_v1  ;;  %289 = vmatpush3.bf16.msra.mxu1 %v312_v3  ;;  %v27_v6 = vld [vmem:[%s404_s0] sm:$0xf]  ;;  %v317_v18 = vld [vmem:[%s405_s5 + $0x8] sm:$0xff]  }
   0x4   :  { %282 = vmatprep.subr.bf16.mxu0 %v318_v0  ;;  %290 = vmatprep.subr.bf16.mxu1 %v318_v0  ;;  %v316_v9 = vld [vmem:[%s405_s5] sm:$0xff]  }
   0x5   :  { %v255_v10 = vld [vmem:[%s406_s2] ss:$0 sm:$0xff] }
   0x6   :  { %v259_v19 = vld [vmem:[%s407_s4] ss:$0 sm:$0xff] }
   0x7   :  { %283 = vmatpush3.bf16.msra.mxu0 %v53_v4  ;;  %291 = vmatpush3.bf16.msra.mxu1 %v313_v5  ;;  %v265_v27 = vld [vmem:[%s408_s6] ss:$0 sm:$0xff] }
   0x8   :  { %300 = vmatprep.subr.bf16.mxu0 %v318_v0  ;;  %292 = vmatprep.subr.bf16.mxu1 %v318_v0 }
   0xa   :  { %285 = vmatmul.mubr.msk.bf16.vlgmr.msra.gmra.mrb[0].mxu0 %vm47_vm2, %v27_v6 }
   0xb   :  { %304 = vmatprep.mubr.msk.bf16.mxu0 %vm319_vm1, %v318_v0  ;;  %293 = vmatpush3.bf16.msra.mxu1 %v314_v7 }
   0xc   :  { %294 = vmatprep.subr.bf16.mxu1 %v318_v0  ;;  %301 = vmatpush3.bf16.msra.mxu0 %v316_v9 }
   0xd   :  { %302 = vmatprep.subr.bf16.mxu0 %v318_v0 }
   0xf   :  { %295 = vmatpush3.bf16.msra.mxu1 %v315_v8 }
  0x10   :  { %303 = vmatpush3.bf16.msra.mxu0 %v317_v18 }
  0xdd   :  { %v89_v11 = vpop.f32.mrb[0].mxu0 }
  0xde   :  { %v90_v12 = vadd.f32 %v255_v10, %v89_v11  ;;  %v286_v13 = vpop.f32.mrb[1].mxu0 }
  0xdf   :  { %v92_v14 = vpop.f32.mrb[2].mxu0 }
  0xe0   :  { %v95_v15 = vmax.f32 %v90_v12, 0.0  ;;  %v287_v16 = vpop.f32.mrb[3].mxu0 }
  0xe2   :  { %v96_v17 = vpack.c.bf16 %v95_v15, %v95_v15 }
  0xe4   :  { %297 = vmatmul.mubr.msk.bf16.vlgmr.msra.gmra.mrb[0].mxu1 %vm136_vm3, %v96_v17 }
 0x1b7   :  { %v174_v20 = vpop.f32.mrb[0].mxu1 }
 0x1b8   :  { %v175_v21 = vadd.f32 %v259_v19, %v174_v20  ;;  %v298_v22 = vpop.f32.mrb[1].mxu1 }
 0x1b9   :  { %v177_v23 = vpop.f32.mrb[2].mxu1 }
 0x1ba   :  { %v180_v24 = vmax.f32 %v175_v21, 0.0  ;;  %v299_v25 = vpop.f32.mrb[3].mxu1 }
 0x1bc   :  { %v181_v26 = vpack.c.bf16 %v180_v24, %v180_v24 }
 0x1be   :  { %305 = vmatmul.mubr.msk.bf16.vlgmr.msra.gmra.mrb[4].mxu0 %vm205_vm4, %v181_v26 }
 0x291   :  { %v243_v28 = vpop.f32.mrb[4].mxu0 }
 0x292   :  { %v244_v29 = vadd.f32 %v265_v27, %v243_v28  ;;  %v306_v30 = vpop.f32.mrb[5].mxu0 }
 0x293   :  { %v246_v31 = vpop.f32.mrb[6].mxu0 }
 0x294   :  { %250 = vst.msk [vmem:[%s409_s7] sm:$0xff] %vm249_vm5, %v244_v29  ;;  %v307_v32 = vpop.f32.mrb[7].mxu0 }

</bundles_post_ra>
